<compile_context>
chip_gen: v7x
topology: tpu7x:2x2x1
jax: 0.10.0
libtpu: 0.0.40
codegen_flags: <defaults>
</compile_context>

<pallas_src>
import math

import jax
import jax.numpy as jnp
from jax.experimental import pallas as pl
from jax.experimental.pallas import tpu as pltpu


# ---------------------------------------------------------------------------
# Kernel
# ---------------------------------------------------------------------------
def _encoder_kernel(idx_ref, tw_ref, b_ref, o_ref):
    """relu(M @ TW + b) where M = [onehot(nodes) | neighbor-counts].

    idx_ref : [TILE_N, 1 + MAX_NB] int32  node ids (col 0), neighbor ids (cols 1..)
    tw_ref  : [2*T, P]   compute dtype    rows [0,T):  table @ W_self
                                          rows [T,2T): (table @ W_neigh) / max_nb
    b_ref   : [1, P]     f32
    o_ref   : [TILE_N, P]
    """
    tile_n, cols = idx_ref.shape
    max_nb = cols - 1
    two_t = tw_ref.shape[0]
    t = two_t // 2
    cd = tw_ref.dtype

    idx = idx_ref[...]
    ids = jax.lax.broadcasted_iota(jnp.int32, (tile_n, two_t), 1)

    # Build M as a single lane-dense [tile_n, 2T] tile (no concat/relayout):
    # node ids live in [0, T) so the self one-hot only hits the first half;
    # neighbor ids shifted by +T only hit the second half.  Counts <= max_nb
    # are exact in bf16, so accumulate directly in the compute dtype.
    m = (idx[:, 0:1] == ids).astype(cd)
    for k in range(1, max_nb + 1):                       # tiny static unroll
        m = m + (idx[:, k:k + 1] + t == ids).astype(cd)

    y = jnp.dot(m, tw_ref[...], preferred_element_type=jnp.float32)
    y = y + b_ref[...]                                   # [1, P] broadcasts
    o_ref[...] = jnp.maximum(y, 0.0).astype(o_ref.dtype)


# ---------------------------------------------------------------------------
# Wrapper
# ---------------------------------------------------------------------------
def _precompute_tw(feature_table, W, combine, max_nb, out_pad, compute_dtype):
    """TW = [table @ W_self ; (table @ W_neigh) / max_nb], padded to out_pad
    lanes and cast to the compute dtype.  Shared by kernel wrapper and the
    rounding-matched reference so rounding points are identical."""
    T, D = feature_table.shape
    hi = jax.lax.Precision.HIGHEST
    if combine == "concat":
        tw_self = jnp.dot(feature_table, W[:D], precision=hi)
        tw_neigh = jnp.dot(feature_table, W[D:], precision=hi)
    else:
        tw_self = jnp.dot(feature_table, W, precision=hi)
        tw_neigh = tw_self
    tw = jnp.concatenate([tw_self, tw_neigh * (1.0 / max_nb)], axis=0)
    out_dim = tw.shape[1]
    tw_pad = jnp.zeros((2 * T, out_pad), jnp.float32).at[:, :out_dim].set(tw)
    return tw_pad.astype(compute_dtype)


def _encoder_forward_impl(nodes, neighbor_ids, feature_table, W, b, *,
                          combine="concat", compute_dtype=jnp.bfloat16,
                          tile_n=128, out_dtype=jnp.float32):
    """Fused Encoder forward: gather + aggregate + project + bias + relu."""
    N = nodes.shape[0]
    T, D = feature_table.shape
    max_nb = neighbor_ids.shape[1]
    out_dim = W.shape[1]

    p = pl.cdiv(out_dim, 128) * 128            # lane-dense (unmasked vst) output
    n_pad = pl.cdiv(N, tile_n) * tile_n        # padded rows reuse id 0; sliced off

    # Packed lane-dense index block: nodes in col 0, neighbors in cols 1..max_nb.
    idx = jnp.zeros((n_pad, 1 + max_nb), jnp.int32)
    idx = idx.at[:N, 0].set(nodes.astype(jnp.int32))
    idx = idx.at[:N, 1:].set(neighbor_ids.astype(jnp.int32))

    tw = _precompute_tw(feature_table, W, combine, max_nb, p, compute_dtype)
    b_pad = jnp.zeros((1, p), jnp.float32).at[0, :out_dim].set(
        b.astype(jnp.float32))

    idx_spec = pl.BlockSpec((tile_n, 1 + max_nb), lambda i: (i, 0))
    tw_spec = pl.BlockSpec((2 * T, p), lambda i: (0, 0),
                           pipeline_mode=pl.Buffered(1))   # grid-invariant
    b_spec = pl.BlockSpec((1, p), lambda i: (0, 0),
                          pipeline_mode=pl.Buffered(1))    # grid-invariant
    out_spec = pl.BlockSpec((tile_n, p), lambda i: (i, 0))

    itemsize = jnp.dtype(compute_dtype).itemsize
    flops = 2 * n_pad * (2 * T) * p
    bytes_accessed = (n_pad * (1 + max_nb) * 4            # indices
                      + 2 * T * p * itemsize              # TW
                      + p * 4                             # bias
                      + n_pad * p * jnp.dtype(out_dtype).itemsize)  # output

    out = pl.pallas_call(
        _encoder_kernel,
        out_shape=jax.ShapeDtypeStruct((n_pad, p), out_dtype),
        grid_spec=pltpu.PrefetchScalarGridSpec(
            num_scalar_prefetch=0,
            grid=(n_pad // tile_n,),
            in_specs=[idx_spec, tw_spec, b_spec],
            out_specs=out_spec,
        ),
        compiler_params=pltpu.CompilerParams(
            dimension_semantics=("parallel",)),
        cost_estimate=pl.CostEstimate(
            flops=flops, transcendentals=0, bytes_accessed=bytes_accessed),
    )(idx, tw, b_pad)
    return out[:N, :out_dim]


# Jit the whole wrapper so padding / casting / TW precompute fuse and cache.
encoder_forward = jax.jit(
    _encoder_forward_impl,
    static_argnames=("combine", "compute_dtype", "tile_n", "out_dtype"))


# ---------------------------------------------------------------------------
# Pure-JAX references (mirror the PyTorch module's forward)
# ---------------------------------------------------------------------------
def reference_forward(nodes, neighbor_ids, feature_table, W, b, combine):
    """Exact f32 reference of Encoder.forward with a mean aggregator."""
    hi = jax.lax.Precision.HIGHEST
    self_feats = feature_table[nodes]
    neigh_feats = feature_table[neighbor_ids].mean(axis=1)
    if combine == "concat":
        combined = jnp.concatenate([self_feats, neigh_feats], axis=1)
    else:
        combined = self_feats + neigh_feats
    return jax.nn.relu(jnp.dot(combined, W, precision=hi) + b)


def reference_forward_quantized(nodes, neighbor_ids, feature_table, W, b,
                                combine, compute_dtype):
    """Reference that mirrors the kernel's rounding points exactly: the same
    precomputed TW matrix rounded to the compute dtype, an exact one-hot /
    count matrix, and f32 accumulation."""
    T, D = feature_table.shape
    max_nb = neighbor_ids.shape[1]
    out_dim = W.shape[1]
    p = pl.cdiv(out_dim, 128) * 128
    tw = _precompute_tw(feature_table, W, combine, max_nb, p, compute_dtype)
    tw = tw.astype(jnp.float32)[:, :out_dim]
    self_oh = jax.nn.one_hot(nodes, T, dtype=jnp.float32)
    cnt = jax.nn.one_hot(neighbor_ids, T, dtype=jnp.float32).sum(axis=1)
    m = jnp.concatenate([self_oh, cnt], axis=1)
    y = jnp.dot(m, tw, precision=jax.lax.Precision.HIGHEST) + b.astype(jnp.float32)
    return jax.nn.relu(y)


# ---------------------------------------------------------------------------
if __name__ == "__main__":
    # ---- deterministic setup mirroring Encoder.__init__ / reset_parameters
    input_dim = 32
    output_dim = 32
    num_table_rows = 64       # rows of the feature ("embedding") table
    N = 512                   # node indices queried in forward() -> 4 grid steps
    max_neighbors = 4         # fan-in of the synthetic mean aggregator
    tile_n = 128              # rows per grid step (node-axis tiling)

    key = jax.random.PRNGKey(0)
    k_feat, k_adj, k_w, k_b, k_w2, k_b2, k_nodes = jax.random.split(key, 7)

    feature_table = jax.random.normal(
        k_feat, (num_table_rows, input_dim), dtype=jnp.float32)

    std = 1.0 / math.sqrt(output_dim)     # reset_parameters: uniform(-std, std)
    W_cat = jax.random.uniform(k_w, (2 * input_dim, output_dim),
                               minval=-std, maxval=std, dtype=jnp.float32)
    b_cat = jax.random.uniform(k_b, (output_dim,),
                               minval=-std, maxval=std, dtype=jnp.float32)
    W_sum = jax.random.uniform(k_w2, (input_dim, output_dim),
                               minval=-std, maxval=std, dtype=jnp.float32)
    b_sum = jax.random.uniform(k_b2, (output_dim,),
                               minval=-std, maxval=std, dtype=jnp.float32)

    nodes = jax.random.randint(k_nodes, (N,), 0, num_table_rows)
    neighbor_ids = jax.random.randint(k_adj, (N, max_neighbors),
                                      0, num_table_rows)

    for combine, W, b in (("concat", W_cat, b_cat), ("sum", W_sum, b_sum)):
        out = encoder_forward(nodes, neighbor_ids, feature_table, W, b,
                              combine=combine, compute_dtype=jnp.bfloat16,
                              tile_n=tile_n, out_dtype=jnp.float32)
        out = jax.block_until_ready(out)
        assert out.shape == (N, output_dim)

        # tight structural check vs. a reference with matching bf16 rounding
        ref_q = reference_forward_quantized(nodes, neighbor_ids, feature_table,
                                            W, b, combine, jnp.bfloat16)
        assert jnp.allclose(out, ref_q, atol=2e-3, rtol=2e-3), \
            f"{combine}: mismatch vs rounding-matched reference"

        # looser check vs. the exact f32 forward of the PyTorch module
        # (tolerance reflects bf16 rounding of the precomputed table @ W)
        ref = reference_forward(nodes, neighbor_ids, feature_table,
                                W, b, combine)
        assert jnp.allclose(out, ref, atol=5e-2, rtol=5e-2), \
            f"{combine}: mismatch vs f32 reference"

    print("KERNEL_OK")
</pallas_src>

<mosaic_0001>
module attributes {stable_mosaic.version = 11 : i64} {
  func.func @_encoder_kernel(%arg0: i32, %arg1: memref<128x5xi32, #tpu.memory_space<vmem>>, %arg2: memref<128x128xbf16, #tpu.memory_space<vmem>>, %arg3: memref<1x128xf32, #tpu.memory_space<vmem>>, %arg4: memref<128x128xf32, #tpu.memory_space<vmem>>) attributes {dimension_semantics = [#tpu.dimension_semantics<parallel>], iteration_bounds = array<i64: 4>, scalar_prefetch = 0 : i64, scratch_operands = 0 : i64, tpu.core_type = #tpu.core_type<tc>, window_params = [{transform_indices = @transform_0, window_bounds = array<i64: 128, 5>}, {pipeline_mode = #tpu.pipeline_mode<synchronous>, transform_indices = @transform_1, window_bounds = array<i64: 128, 128>}, {pipeline_mode = #tpu.pipeline_mode<synchronous>, transform_indices = @transform_2, window_bounds = array<i64: 1, 128>}, {transform_indices = @transform_3, window_bounds = array<i64: 128, 128>}]} {
    %c0 = arith.constant 0 : index
    %c0_0 = arith.constant 0 : index
    %0 = vector.load %arg1[%c0, %c0_0] : memref<128x5xi32, #tpu.memory_space<vmem>>, vector<128x5xi32>
    %1 = tpu.iota {dimensions = array<i32: 1>} : vector<128x128xi32>
    %2 = vector.extract_strided_slice %0 {offsets = [0, 0], sizes = [128, 1], strides = [1, 1]} : vector<128x5xi32> to vector<128x1xi32>
    %3 = vector.broadcast %2 : vector<128x1xi32> to vector<128x128xi32>
    %4 = arith.cmpi eq, %3, %1 : vector<128x128xi32>
    %5 = arith.extui %4 : vector<128x128xi1> to vector<128x128xi32>
    %6 = arith.sitofp %5 : vector<128x128xi32> to vector<128x128xf32>
    %7 = arith.truncf %6 : vector<128x128xf32> to vector<128x128xbf16>
    %8 = vector.extract_strided_slice %0 {offsets = [0, 1], sizes = [128, 1], strides = [1, 1]} : vector<128x5xi32> to vector<128x1xi32>
    %c64_i32 = arith.constant 64 : i32
    %9 = vector.broadcast %c64_i32 : i32 to vector<128x1xi32>
    %10 = arith.addi %8, %9 : vector<128x1xi32>
    %11 = vector.broadcast %10 : vector<128x1xi32> to vector<128x128xi32>
    %12 = arith.cmpi eq, %11, %1 : vector<128x128xi32>
    %13 = arith.extui %12 : vector<128x128xi1> to vector<128x128xi32>
    %14 = arith.sitofp %13 : vector<128x128xi32> to vector<128x128xf32>
    %15 = arith.truncf %14 : vector<128x128xf32> to vector<128x128xbf16>
    %16 = arith.addf %7, %15 : vector<128x128xbf16>
    %17 = vector.extract_strided_slice %0 {offsets = [0, 2], sizes = [128, 1], strides = [1, 1]} : vector<128x5xi32> to vector<128x1xi32>
    %c64_i32_1 = arith.constant 64 : i32
    %18 = vector.broadcast %c64_i32_1 : i32 to vector<128x1xi32>
    %19 = arith.addi %17, %18 : vector<128x1xi32>
    %20 = vector.broadcast %19 : vector<128x1xi32> to vector<128x128xi32>
    %21 = arith.cmpi eq, %20, %1 : vector<128x128xi32>
    %22 = arith.extui %21 : vector<128x128xi1> to vector<128x128xi32>
    %23 = arith.sitofp %22 : vector<128x128xi32> to vector<128x128xf32>
    %24 = arith.truncf %23 : vector<128x128xf32> to vector<128x128xbf16>
    %25 = arith.addf %16, %24 : vector<128x128xbf16>
    %26 = vector.extract_strided_slice %0 {offsets = [0, 3], sizes = [128, 1], strides = [1, 1]} : vector<128x5xi32> to vector<128x1xi32>
    %c64_i32_2 = arith.constant 64 : i32
    %27 = vector.broadcast %c64_i32_2 : i32 to vector<128x1xi32>
    %28 = arith.addi %26, %27 : vector<128x1xi32>
    %29 = vector.broadcast %28 : vector<128x1xi32> to vector<128x128xi32>
    %30 = arith.cmpi eq, %29, %1 : vector<128x128xi32>
    %31 = arith.extui %30 : vector<128x128xi1> to vector<128x128xi32>
    %32 = arith.sitofp %31 : vector<128x128xi32> to vector<128x128xf32>
    %33 = arith.truncf %32 : vector<128x128xf32> to vector<128x128xbf16>
    %34 = arith.addf %25, %33 : vector<128x128xbf16>
    %35 = vector.extract_strided_slice %0 {offsets = [0, 4], sizes = [128, 1], strides = [1, 1]} : vector<128x5xi32> to vector<128x1xi32>
    %c64_i32_3 = arith.constant 64 : i32
    %36 = vector.broadcast %c64_i32_3 : i32 to vector<128x1xi32>
    %37 = arith.addi %35, %36 : vector<128x1xi32>
    %38 = vector.broadcast %37 : vector<128x1xi32> to vector<128x128xi32>
    %39 = arith.cmpi eq, %38, %1 : vector<128x128xi32>
    %40 = arith.extui %39 : vector<128x128xi1> to vector<128x128xi32>
    %41 = arith.sitofp %40 : vector<128x128xi32> to vector<128x128xf32>
    %42 = arith.truncf %41 : vector<128x128xf32> to vector<128x128xbf16>
    %43 = arith.addf %34, %42 : vector<128x128xbf16>
    %c0_4 = arith.constant 0 : index
    %c0_5 = arith.constant 0 : index
    %44 = vector.load %arg2[%c0_4, %c0_5] : memref<128x128xbf16, #tpu.memory_space<vmem>>, vector<128x128xbf16>
    %cst = arith.constant dense<0.000000e+00> : vector<128x128xf32>
    %45 = tpu.matmul %43, %44, %cst {dimension_numbers = #tpu.dot_dimension_numbers<[1], [0], [0], [1], [0, 0, 1, 1], [], []>} : vector<128x128xbf16>, vector<128x128xbf16>, vector<128x128xf32> -> vector<128x128xf32>
    %c0_6 = arith.constant 0 : index
    %c0_7 = arith.constant 0 : index
    %46 = vector.load %arg3[%c0_6, %c0_7] : memref<1x128xf32, #tpu.memory_space<vmem>>, vector<1x128xf32>
    %47 = vector.broadcast %46 : vector<1x128xf32> to vector<128x128xf32>
    %48 = arith.addf %45, %47 : vector<128x128xf32>
    %cst_8 = arith.constant 0.000000e+00 : f32
    %49 = vector.broadcast %cst_8 : f32 to vector<128x128xf32>
    %50 = arith.maximumf %48, %49 : vector<128x128xf32>
    %c0_9 = arith.constant 0 : index
    %c0_10 = arith.constant 0 : index
    %51 = vector.load %arg4[%c0_9, %c0_10] : memref<128x128xf32, #tpu.memory_space<vmem>>, vector<128x128xf32>
    tpu.vector_store %arg4[%c0_9, %c0_10], %50 {strides = array<i32>} : memref<128x128xf32, #tpu.memory_space<vmem>>, vector<128x128xf32>,
    return
  }
  func.func @transform_0(%arg0: i32) -> (i32, i32) {
    %c0_i32 = arith.constant 0 : i32
    %c0_i32_0 = arith.constant 0 : i32
    return %arg0, %c0_i32 : i32, i32
  }
  func.func @transform_1(%arg0: i32) -> (i32, i32) {
    %c0_i32 = arith.constant 0 : i32
    %c0_i32_0 = arith.constant 0 : i32
    %c0_i32_1 = arith.constant 0 : i32
    return %c0_i32, %c0_i32_0 : i32, i32
  }
  func.func @transform_2(%arg0: i32) -> (i32, i32) {
    %c0_i32 = arith.constant 0 : i32
    %c0_i32_0 = arith.constant 0 : i32
    %c0_i32_1 = arith.constant 0 : i32
    return %c0_i32, %c0_i32_0 : i32, i32
  }
  func.func @transform_3(%arg0: i32) -> (i32, i32) {
    %c0_i32 = arith.constant 0 : i32
    %c0_i32_0 = arith.constant 0 : i32
    return %arg0, %c0_i32 : i32, i32
  }
}

</mosaic_0001>

<bundles_post_ra>
// kernel: _encoder_forward_impl.1
= control target key start
LH: loop header
LB: loop body
LE: loop exit
PB: predicated region body
PF: predicated region fallthrough
CT: control target
= control target key end

     0   :  { %s1256_s12 = smov 0   ;;  %s1715_s0 = inlined_call_operand.vmem [shape: s32[512,5], index: 0, kind: input, shape index: {}]   ;;  %s1716_s1 = inlined_call_operand.vmem [shape: bf16[128,128], index: 1, kind: input, shape index: {}]   ;;  %s1717_s2 = inlined_call_operand.vmem [shape: f32[1,128], index: 2, kind: input, shape index: {}]   ;;  %s1718_s3 = inlined_call_operand.vmem [shape: f32[512,128], index: 3, kind: output, shape index: {}]  }
   0x1 LB: > { %s1017_s13 = sadd.s32 4294967295, %s1228_s12   ;;  %p1021_p0 = scmp.ge.s32.totalorder %s1228_s12, 1  ;;  %s1228_s12 = sphi %s1256_s12, %s13_s12  }
   0x2   : > { %p138_p1 = scmp.lt.s32.totalorder %s1228_s12, 5 }
   0x4   : > { %p139_p2 = pnand %p1021_p0, %p138_p1 }
   0x5   : > { %s1022_s14 = sshll.u32 (!%p139_p2), %s1017_s13, 4  ;;  %v1230_v0 = vmov (!%p139_p2), 0   ;;  %v1231_v9 = vmov (!%p139_p2), 1   ;;  %v1232_v23 = vmov (!%p139_p2), 2   ;;  %v1233_v27 = vmov (!%p139_p2), 3   ;;  %v1214_v32 = vld [vmem:[%s1716_s1] sm:$0xff] (!%p139_p2)  }
   0x6   : > { %142 = sbr.rel (%p139_p2) target bundleno = 564 (0x234), region = 32  ;;  %1196 = vset.pattern.permute.xlu1 (!%p139_p2), %v1230_v0  ;;  %1195 = vset.pattern.permute.xlu0 (!%p139_p2), %v1230_v0  ;;  %p163_p3 = scmp.lt.s32.totalorder (!%p139_p2), %s1022_s14, 63  ;;  %v1234_v31 = vmov (!%p139_p2), 4   ;;  %v1215_v33 = vld [vmem:[%s1716_s1 + $0x8] sm:$0xff] (!%p139_p2)   ;;  %v1216_v34 = vld [vmem:[%s1716_s1 + $0x10] sm:$0xff] (!%p139_p2)   ;;  %v1217_v38 = vld [vmem:[%s1716_s1 + $0x18] sm:$0xff] (!%p139_p2)   ;;  %v191_v45 = vlaneseq (!%p139_p2) }
   0x7   : > { %1133 = vmatprep.subr.bf16.mxu0 (!%p139_p2), %v1214_v32  ;;  %1165 = vmatprep.subr.bf16.mxu1 (!%p139_p2), %v1214_v32  ;;  %v1218_v40 = vld [vmem:[%s1716_s1 + $0x20] sm:$0xff] (!%p139_p2)   ;;  %v1219_v42 = vld [vmem:[%s1716_s1 + $0x28] sm:$0xff] (!%p139_p2)   ;;  %v1220_v43 = vld [vmem:[%s1716_s1 + $0x30] sm:$0xff] (!%p139_p2)   ;;  %v1235_v49 = vmov (!%p139_p2), 0.0  }
   0x8   : > { %1134 = vmatpush3.bf16.msra.mxu0 (!%p139_p2), %v1214_v32  ;;  %1173 = vmatpush3.bf16.msra.mxu1 (!%p139_p2), %v1214_v32  ;;  %v1221_v44 = vld [vmem:[%s1716_s1 + $0x38] sm:$0xff] (!%p139_p2)   ;;  %v1384_v46 = vand.u32 (!%p139_p2), 127, %v191_v45 }
   0x9   : > { %1135 = vmatprep.subr.bf16.mxu0 (!%p139_p2), %v1215_v33  ;;  %1166 = vmatprep.subr.bf16.mxu1 (!%p139_p2), %v1215_v33 }
   0xc   : > { %1136 = vmatpush3.bf16.msra.mxu0 (!%p139_p2), %v1215_v33  ;;  %1174 = vmatpush3.bf16.msra.mxu1 (!%p139_p2), %v1215_v33 }
   0xd   : > { %s1720_s14 = smov (!%p163_p3, %s1022_s14), 63  ;;  %1137 = vmatprep.subr.bf16.mxu0 %v1216_v34  ;;  %1167 = vmatprep.subr.bf16.mxu1 %v1216_v34 }
   0xe   : > { %s1023_s15 = sshll.u32 %s1720_s14, 3 }
   0xf   : > { %s1274_s18 = scalar_lea.vmem %s1715_s0, %s1023_s15  ;;  %s1694_s13 = scalar_lea.vmem %s1718_s3, %s1023_s15 }
  0x10   : > { %v177_v1 = vld [vmem:[%s1274_s18 + $0x10] sm:$0xff]  ;;  %v175_v2 = vld [vmem:[%s1274_s18] sm:$0xff]  ;;  %v178_v3 = vld [vmem:[%s1274_s18 + $0x18] sm:$0xff]  ;;  %1138 = vmatpush3.bf16.msra.mxu0 %v1216_v34  ;;  %1175 = vmatpush3.bf16.msra.mxu1 %v1216_v34 }
  0x11   : > { %200 = vperm.xlu1 %1196, %v177_v1   ;;  %194 = vperm.xlu0 %1195, %v175_v2   ;;  %v176_v4 = vld [vmem:[%s1274_s18 + $0x8] sm:$0xff]  ;;  %v183_v6 = vld [vmem:[%s1274_s18 + $0x40] sm:$0xff]  ;;  %v186_v8 = vld [vmem:[%s1274_s18 + $0x58] sm:$0xff]  ;;  %v1294_v15 = vadd.s32 64, %v177_v1  ;;  %v300_v17 = vadd.s32 64, %v178_v3  ;;  %v297_v18 = vadd.s32 64, %v175_v2 }
  0x12   : > { %v184_v5 = vld [vmem:[%s1274_s18 + $0x48] sm:$0xff]  ;;  %v1282_v7 = vadd.s32 64, %v176_v4  ;;  %v305_v10 = vadd.s32 64, %v183_v6  ;;  %v179_v11 = vld [vmem:[%s1274_s18 + $0x20] sm:$0xff]  ;;  %v185_v13 = vld [vmem:[%s1274_s18 + $0x50] sm:$0xff]  ;;  %v308_v19 = vadd.s32 64, %v186_v8  ;;  %1139 = vmatprep.subr.bf16.mxu0 %v1217_v38  ;;  %1168 = vmatprep.subr.bf16.mxu1 %v1217_v38 }
  0x13   : > { %v188_v12 = vld [vmem:[%s1274_s18 + $0x68] sm:$0xff]  ;;  %v1292_v14 = vld [vmem:[%s1274_s18 + $0x30] sm:$0xff]  ;;  %v190_v16 = vld [vmem:[%s1274_s18 + $0x78] sm:$0xff]  ;;  %v306_v20 = vadd.s32 64, %v184_v5  ;;  %v1301_v21 = vadd.s32 64, %v185_v13  ;;  %v1321_v28 = vadd.s32 64, %v179_v11 }
  0x14   : > { %v180_v22 = vld [vmem:[%s1274_s18 + $0x28] sm:$0xff]  ;;  %v1309_v25 = vld [vmem:[%s1274_s18 + $0x38] sm:$0xff]  ;;  %v1324_v29 = vadd.s32 64, %v188_v12  ;;  %v1330_v30 = vadd.s32 64, %v190_v16  ;;  %v1347_v35 = vadd.s32 64, %v1292_v14  ;;  %v187_v36 = vld [vmem:[%s1274_s18 + $0x60] sm:$0xff]  ;;  %1140 = vmatpush3.bf16.msra.mxu0 %v1217_v38  ;;  %1176 = vmatpush3.bf16.msra.mxu1 %v1217_v38 }
  0x15   : > { %203 = vperm.xlu1 %1196, %v178_v3   ;;  %197 = vperm.xlu0 %1195, %v176_v4   ;;  %v1306_v24 = vadd.s32 64, %v180_v22  ;;  %v1313_v26 = vadd.s32 64, %v1309_v25  ;;  %v189_v37 = vld [vmem:[%s1274_s18 + $0x70] sm:$0xff]  ;;  %v1363_v41 = vadd.s32 64, %v187_v36 }
  0x16   : > { %v1356_v39 = vadd.s32 64, %v189_v37  ;;  %1141 = vmatprep.subr.bf16.mxu0 %v1218_v40  ;;  %1169 = vmatprep.subr.bf16.mxu1 %v1218_v40 }
  0x18   : > { %1142 = vmatpush3.bf16.msra.mxu0 %v1218_v40  ;;  %1177 = vmatpush3.bf16.msra.mxu1 %v1218_v40 }
  0x19   : > { %221 = vperm.xlu1 %1196, %v184_v5   ;;  %218 = vperm.xlu0 %1195, %v183_v6  }
  0x1a   : > { %1143 = vmatprep.subr.bf16.mxu0 %v1219_v42  ;;  %1170 = vmatprep.subr.bf16.mxu1 %v1219_v42 }
  0x1c   : > { %1144 = vmatpush3.bf16.msra.mxu0 %v1219_v42  ;;  %1178 = vmatpush3.bf16.msra.mxu1 %v1219_v42 }
  0x1d   : > { %1197 = vset.pattern.permute.xlu1 %v1231_v9  ;;  %227 = vperm.xlu0 %1195, %v186_v8  }
  0x1e   : > { %317 = vperm.xlu1 %1197, %v1282_v7   ;;  %1145 = vmatprep.subr.bf16.mxu0 %v1220_v43 }
  0x1f   : > { %1171 = vmatprep.subr.bf16.mxu1 %v1220_v43 }
  0x20   : > { %1146 = vmatpush3.bf16.msra.mxu0 %v1220_v43  ;;  %1179 = vmatpush3.bf16.msra.mxu1 %v1220_v43 }
  0x21   : > { %206 = vperm.xlu0 %1195, %v179_v11   ;;  %1147 = vmatprep.subr.bf16.mxu0 %v1221_v44 }
  0x22   : > { %338 = vperm.xlu1 %1197, %v305_v10   ;;  %1172 = vmatprep.subr.bf16.mxu1 %v1221_v44 }
  0x24   : > { %1148 = vmatpush3.bf16.msra.mxu0 %v1221_v44  ;;  %1180 = vmatpush3.bf16.msra.mxu1 %v1221_v44 }
  0x25   : > { %233 = vperm.xlu0 %1195, %v188_v12  }
  0x26   : > { %1198 = vset.pattern.permute.xlu1 %v1230_v0 }
  0x27   : > { %224 = vperm.xlu1 %1198, %v185_v13  }
  0x29   : > { %212 = vperm.xlu0 %1195, %v1292_v14  }
  0x2b   : > { %1199 = vset.pattern.permute.xlu1 %v1231_v9 }
  0x2c   : > { %320 = vperm.xlu1 %1199, %v1294_v15  }
  0x2d   : > { %239 = vperm.xlu0 %1195, %v190_v16  }
  0x30   : > { %323 = vperm.xlu1 %1199, %v300_v17  }
  0x31   : > { %1206 = vset.pattern.permute.xlu0 %v1231_v9 }
  0x32   : > { %314 = vperm.xlu0 %1206, %v297_v18  }
  0x34   : > { %347 = vperm.xlu1 %1199, %v308_v19  }
  0x36   : > { %341 = vperm.xlu0 %1206, %v306_v20  }
  0x38   : > { %1200 = vset.pattern.permute.xlu1 %v1232_v23 }
  0x39   : > { %426 = vperm.xlu1 %1200, %v297_v18  }
  0x3a   : > { %344 = vperm.xlu0 %1206, %v1301_v21  }
  0x3d   : > { %450 = vperm.xlu1 %1200, %v305_v10  }
  0x3e   : > { %329 = vperm.xlu0 %1206, %v1306_v24  }
  0x41   : > { %453 = vperm.xlu1 %1200, %v306_v20  }
  0x42   : > { %335 = vperm.xlu0 %1206, %v1313_v26  }
  0x45   : > { %435 = vperm.xlu1 %1200, %v300_v17  }
  0x46   : > { %1208 = vset.pattern.permute.xlu0 %v1232_v23 }
  0x47   : > { %429 = vperm.xlu0 %1208, %v1282_v7  }
  0x49   : > { %459 = vperm.xlu1 %1200, %v308_v19  }
  0x4b   : > { %432 = vperm.xlu0 %1208, %v1294_v15  }
  0x4d   : > { %1201 = vset.pattern.permute.xlu1 %v1233_v27 }
  0x4e   : > { %541 = vperm.xlu1 %1201, %v1282_v7  }
  0x4f   : > { %456 = vperm.xlu0 %1208, %v1301_v21  }
  0x52   : > { %562 = vperm.xlu1 %1201, %v305_v10  }
  0x53   : > { %438 = vperm.xlu0 %1208, %v1321_v28  }
  0x56   : > { %544 = vperm.xlu1 %1201, %v1294_v15  }
  0x57   : > { %465 = vperm.xlu0 %1208, %v1324_v29  }
  0x5a   : > { %568 = vperm.xlu1 %1201, %v1301_v21  }
  0x5b   : > { %447 = vperm.xlu0 %1208, %v1313_v26  }
  0x5e   : > { %1202 = vset.pattern.permute.xlu1 %v1234_v31 }
  0x5f   : > { %471 = vperm.xlu0 %1208, %v1330_v30   ;;  %650 = vperm.xlu1 %1202, %v297_v18  }
  0x63   : > { %1210 = vset.pattern.permute.xlu0 %v1233_v27  ;;  %674 = vperm.xlu1 %1202, %v305_v10  }
  0x64   : > { %538 = vperm.xlu0 %1210, %v297_v18  }
  0x67   : > { %677 = vperm.xlu1 %1202, %v306_v20  }
  0x68   : > { %565 = vperm.xlu0 %1210, %v306_v20  }
  0x6b   : > { %659 = vperm.xlu1 %1202, %v300_v17  }
  0x6c   : > { %547 = vperm.xlu0 %1210, %v300_v17  }
  0x6f   : > { %683 = vperm.xlu1 %1202, %v308_v19  }
  0x70   : > { %571 = vperm.xlu0 %1210, %v308_v19  }
  0x73   : > { %1203 = vset.pattern.permute.xlu1 %v1230_v0 }
  0x74   : > { %553 = vperm.xlu0 %1210, %v1306_v24   ;;  %209 = vperm.xlu1 %1203, %v180_v22  }
  0x78   : > { %556 = vperm.xlu0 %1210, %v1347_v35   ;;  %230 = vperm.xlu1 %1203, %v187_v36  }
  0x7c   : > { %580 = vperm.xlu0 %1210, %v1356_v39   ;;  %1204 = vset.pattern.permute.xlu1 %v1231_v9 }
  0x7d   : > { %326 = vperm.xlu1 %1204, %v1321_v28  }
  0x80   : > { %1212 = vset.pattern.permute.xlu0 %v1234_v31 }
  0x81   : > { %653 = vperm.xlu0 %1212, %v1282_v7   ;;  %350 = vperm.xlu1 %1204, %v1363_v41  }
  0x85   : > { %656 = vperm.xlu0 %1212, %v1294_v15   ;;  %353 = vperm.xlu1 %1204, %v1324_v29  }
  0x89   : > { %680 = vperm.xlu0 %1212, %v1301_v21   ;;  %1205 = vset.pattern.permute.xlu1 %v1230_v0 }
  0x8a   : > { %215 = vperm.xlu1 %1205, %v1309_v25  }
  0x8d   : > { %662 = vperm.xlu0 %1212, %v1321_v28  }
  0x8e   : > { %236 = vperm.xlu1 %1205, %v189_v37  }
  0x90   : > { %v201_v47 = vpop.permute.xlu1 %200  ;;  %v195_v48 = vpop.permute.xlu0 %194 }
  0x91   : > { %vm241_vm0 = vcmp.eq.s32.totalorder %v195_v48, %v1384_v46  ;;  %689 = vperm.xlu0 %1212, %v1324_v29   ;;  %vm243_vm1 = vcmp.eq.s32.totalorder %v201_v47, %v1384_v46 }
  0x92   : > { %1207 = vset.pattern.permute.xlu1 %v1231_v9  ;;  %v1026_v50 = vsel %vm241_vm0, 1.0, %v1235_v49  ;;  %v1028_v53 = vsel %vm243_vm1, 1.0, %v1235_v49 }
  0x93   : > { %332 = vperm.xlu1 %1207, %v1347_v35  }
  0x94   : > { %v204_v51 = vpop.permute.xlu1 %203  ;;  %v198_v52 = vpop.permute.xlu0 %197 }
  0x95   : > { %vm244_vm2 = vcmp.eq.s32.totalorder %v204_v51, %v1384_v46  ;;  %vm242_vm3 = vcmp.eq.s32.totalorder %v198_v52, %v1384_v46  ;;  %671 = vperm.xlu0 %1212, %v1313_v26  }
  0x96   : > { %v1029_v54 = vsel %vm244_vm2, 1.0, %v1235_v49  ;;  %v1027_v55 = vsel %vm242_vm3, 1.0, %v1235_v49 }
  0x97   : > { %v290_v56 = vpack.c.bf16 %v1029_v54, %v1028_v53  ;;  %v289_v57 = vpack.c.bf16 %v1027_v55, %v1026_v50  ;;  %356 = vperm.xlu1 %1207, %v1356_v39  }
  0x98   : > { %v222_v58 = vpop.permute.xlu1 %221  ;;  %v219_v59 = vpop.permute.xlu0 %218 }
  0x99   : > { %vm250_vm4 = vcmp.eq.s32.totalorder %v222_v58, %v1384_v46  ;;  %vm249_vm5 = vcmp.eq.s32.totalorder %v219_v59, %v1384_v46  ;;  %695 = vperm.xlu0 %1212, %v1330_v30  }
  0x9a   : > { %v1403_v60 = vsel %vm250_vm4, 1.0, %v1235_v49  ;;  %v1406_v61 = vsel %vm249_vm5, 1.0, %v1235_v49 }
  0x9b   : > { %v293_v62 = vpack.c.bf16 %v1403_v60, %v1406_v61  ;;  %359 = vperm.xlu1 %1207, %v1330_v30  }
  0x9c   : > { %v228_v63 = vpop.permute.xlu0 %227 }
  0x9d   : > { %v318_v0 = vpop.permute.xlu1 %317  ;;  %vm252_vm6 = vcmp.eq.s32.totalorder %v228_v63, %v1384_v46 }
  0x9e   : > { %v1037_v4 = vsel %vm252_vm6, 1.0, %v1235_v49  ;;  %vm362_vm9 = vcmp.eq.s32.totalorder %v318_v0, %v1384_v46 }
  0x9f   : > { %1209 = vset.pattern.permute.xlu1 %v1232_v23  ;;  %v1043_v16 = vsel %vm362_vm9, 1.0, %v1235_v49 }
  0xa0   : > { %441 = vperm.xlu1 %1209, %v1306_v24   ;;  %v1413_v1 = vpop.permute.xlu0 %206 }
  0xa1   : > { %v1415_v2 = vpop.permute.xlu1 %338  ;;  %vm245_vm6 = vcmp.eq.s32.totalorder %v1413_v1, %v1384_v46 }
  0xa2   : > { %vm369_vm15 = vcmp.eq.s32.totalorder %v1415_v2, %v1384_v46 }
  0xa3   : > { %v1050_v51 = vsel %vm369_vm15, 1.0, %v1235_v49 }
  0xa4   : > { %462 = vperm.xlu1 %1209, %v1363_v41   ;;  %v1419_v3 = vpop.permute.xlu0 %233 }
  0xa6   : > { %v225_v5 = vpop.permute.xlu1 %224 }
  0xa7   : > { %vm251_vm7 = vcmp.eq.s32.totalorder %v225_v5, %v1384_v46 }
  0xa8   : > { %v1036_v6 = vsel %vm251_vm7, 1.0, %v1235_v49  ;;  %444 = vperm.xlu1 %1209, %v1347_v35   ;;  %v1425_v7 = vpop.permute.xlu0 %212 }
  0xa9   : > { %v294_v8 = vpack.c.bf16 %v1037_v4, %v1036_v6 }
  0xab   : > { %v321_v9 = vpop.permute.xlu1 %320 }
  0xac   : > { %468 = vperm.xlu1 %1209, %v1356_v39   ;;  %v1428_v10 = vpop.permute.xlu0 %239  ;;  %vm363_vm8 = vcmp.eq.s32.totalorder %v321_v9, %v1384_v46 }
  0xad   : > { %v1044_v12 = vsel %vm363_vm8, 1.0, %v1235_v49  ;;  %vm254_vm8 = vcmp.eq.s32.totalorder %v1419_v3, %v1384_v46 }
  0xae   : > { %v1532_v1 = vsel %vm254_vm8, 1.0, %v1235_v49 }
  0xaf   : > { %v324_v11 = vpop.permute.xlu1 %323 }
  0xb0   : > { %vm364_vm10 = vcmp.eq.s32.totalorder %v324_v11, %v1384_v46  ;;  %1211 = vset.pattern.permute.xlu1 %v1233_v27 }
  0xb1   : > { %v1045_v13 = vsel %vm364_vm10, 1.0, %v1235_v49  ;;  %v315_v14 = vpop.permute.xlu0 %314  ;;  %550 = vperm.xlu1 %1211, %v1321_v28  }
  0xb2   : > { %v410_v15 = vpack.c.bf16 %v1045_v13, %v1044_v12  ;;  %vm361_vm11 = vcmp.eq.s32.totalorder %v315_v14, %v1384_v46 }
  0xb3   : > { %v1042_v17 = vsel %vm361_vm11, 1.0, %v1235_v49  ;;  %v348_v18 = vpop.permute.xlu1 %347 }
  0xb4   : > { %v1440_v19 = vadd.bf16 %v410_v15, %v290_v56  ;;  %v409_v20 = vpack.c.bf16 %v1043_v16, %v1042_v17  ;;  %vm372_vm12 = vcmp.eq.s32.totalorder %v348_v18, %v1384_v46  ;;  %v1030_v15 = vsel %vm245_vm6, 1.0, %v1235_v49 }
  0xb5   : > { %v342_v21 = vpop.permute.xlu0 %341  ;;  %574 = vperm.xlu1 %1211, %v1363_v41   ;;  %v1053_v27 = vsel %vm372_vm12, 1.0, %v1235_v49 }
  0xb6   : > { %v1443_v22 = vadd.bf16 %v409_v20, %v289_v57  ;;  %vm370_vm14 = vcmp.eq.s32.totalorder %v342_v21, %v1384_v46 }
  0xb8   : > { %v1446_v23 = vpop.permute.xlu1 %426 }
  0xb9   : > { %v345_v25 = vpop.permute.xlu0 %344  ;;  %577 = vperm.xlu1 %1211, %v1324_v29   ;;  %vm473_vm10 = vcmp.eq.s32.totalorder %v1446_v23, %v1384_v46 }
  0xba   : > { %vm371_vm13 = vcmp.eq.s32.totalorder %v345_v25, %v1384_v46  ;;  %v1058_v25 = vsel %vm473_vm10, 1.0, %v1235_v49 }
  0xbb   : > { %v1052_v28 = vsel %vm371_vm13, 1.0, %v1235_v49 }
  0xbc   : > { %v414_v32 = vpack.c.bf16 %v1053_v27, %v1052_v28  ;;  %v451_v33 = vpop.permute.xlu1 %450 }
  0xbd   : > { %559 = vperm.xlu1 %1211, %v1313_v26   ;;  %v1453_v34 = vpop.permute.xlu0 %329  ;;  %vm481_vm1 = vcmp.eq.s32.totalorder %v451_v33, %v1384_v46 }
  0xbe   : > { %v1455_v36 = vadd.bf16 %v414_v32, %v294_v8  ;;  %v1066_v55 = vsel %vm481_vm1, 1.0, %v1235_v49  ;;  %vm366_vm13 = vcmp.eq.s32.totalorder %v1453_v34, %v1384_v46 }
  0xbf   : > { %v1047_v34 = vsel %vm366_vm13, 1.0, %v1235_v49 }
  0xc0   : > { %v454_v37 = vpop.permute.xlu1 %453 }
  0xc1   : > { %583 = vperm.xlu1 %1211, %v1330_v30   ;;  %v1458_v38 = vpop.permute.xlu0 %335  ;;  %vm482_vm0 = vcmp.eq.s32.totalorder %v454_v37, %v1384_v46 }
  0xc2   : > { %v1067_v52 = vsel %vm482_vm0, 1.0, %v1235_v49 }
  0xc3   : > { %v525_v56 = vpack.c.bf16 %v1067_v52, %v1066_v55 }
  0xc4   : > { %v1460_v29 = vpop.permute.xlu1 %435 }
  0xc5   : > { %1213 = vset.pattern.permute.xlu1 %v1234_v31  ;;  %vm476_vm15 = vcmp.eq.s32.totalorder %v1460_v29, %v1384_v46 }
  0xc6   : > { %v1463_v40 = vpop.permute.xlu0 %429  ;;  %665 = vperm.xlu1 %1213, %v1306_v24  }
  0xc7   : > { %vm474_vm9 = vcmp.eq.s32.totalorder %v1463_v40, %v1384_v46  ;;  %v1061_v40 = vsel %vm476_vm15, 1.0, %v1235_v49  ;;  %vm247_vm15 = vcmp.eq.s32.totalorder %v1425_v7, %v1384_v46 }
  0xc8   : > { %v1466_v42 = vpop.permute.xlu1 %459  ;;  %v1059_v21 = vsel %vm474_vm9, 1.0, %v1235_v49 }
  0xc9   : > { %v521_v28 = vpack.c.bf16 %v1059_v21, %v1058_v25  ;;  %vm484_vm6 = vcmp.eq.s32.totalorder %v1466_v42, %v1384_v46  ;;  %v1032_v25 = vsel %vm247_vm15, 1.0, %v1235_v49 }
  0xca   : > { %v1468_v26 = vpop.permute.xlu0 %432  ;;  %686 = vperm.xlu1 %1213, %v1363_v41  }
  0xcd   : > { %v1471_v43 = vpop.permute.xlu1 %541 }
  0xce   : > { %v1473_v44 = vpop.permute.xlu0 %456  ;;  %668 = vperm.xlu1 %1213, %v1347_v35   ;;  %v1051_v35 = vsel %vm370_vm14, 1.0, %v1235_v49  ;;  %vm475_vm14 = vcmp.eq.s32.totalorder %v1468_v26, %v1384_v46  ;;  %vm586_vm0 = vcmp.eq.s32.totalorder %v1471_v43, %v1384_v46 }
  0xcf   : > { %v413_v54 = vpack.c.bf16 %v1051_v35, %v1050_v51  ;;  %v1060_v37 = vsel %vm475_vm14, 1.0, %v1235_v49  ;;  %v1075_v29 = vsel %vm586_vm0, 1.0, %v1235_v49  ;;  %vm368_vm0 = vcmp.eq.s32.totalorder %v1458_v38, %v1384_v46 }
  0xd0   : > { %v522_v35 = vpack.c.bf16 %v1061_v40, %v1060_v37 }
  0xd1   : > { %v563_v30 = vpop.permute.xlu1 %562  ;;  %v421_v59 = vadd.bf16 %v413_v54, %v293_v62 }
  0xd2   : > { %692 = vperm.xlu1 %1213, %v1356_v39   ;;  %v1477_v31 = vpop.permute.xlu0 %438  ;;  %vm593_vm2 = vcmp.eq.s32.totalorder %v563_v30, %v1384_v46 }
  0xd3   : > { %v1082_v63 = vsel %vm593_vm2, 1.0, %v1235_v49  ;;  %v533_v6 = vadd.bf16 %v525_v56, %v421_v59 }
  0xd5   : > { %v1479_v45 = vpop.permute.xlu1 %544 }
  0xd6   : > { %v1481_v24 = vpop.permute.xlu0 %465 }
  0xd9   : > { %v1483_v47 = vpop.permute.xlu1 %568 }
  0xda   : > { %v1485_v48 = vpop.permute.xlu0 %447  ;;  %vm595_vm9 = vcmp.eq.s32.totalorder %v1483_v47, %v1384_v46  ;;  %v530_v47 = vadd.bf16 %v522_v35, %v1440_v19 }
  0xde   : > { %v1488_v41 = vpop.permute.xlu1 %650  ;;  %v1490_v50 = vpop.permute.xlu0 %471 }
  0xe2   : > { %v675_v39 = vpop.permute.xlu1 %674 }
  0xe3   : > { %v539_v53 = vpop.permute.xlu0 %538  ;;  %vm705_vm4 = vcmp.eq.s32.totalorder %v675_v39, %v1384_v46 }
  0xe4   : > { %v1098_v8 = vsel %vm705_vm4, 1.0, %v1235_v49  ;;  %vm585_vm12 = vcmp.eq.s32.totalorder %v539_v53, %v1384_v46  ;;  %vm587_vm4 = vcmp.eq.s32.totalorder %v1479_v45, %v1384_v46 }
  0xe5   : > { %v1074_v32 = vsel %vm585_vm12, 1.0, %v1235_v49 }
  0xe6   : > { %v678_v57 = vpop.permute.xlu1 %677  ;;  %v633_v43 = vpack.c.bf16 %v1075_v29, %v1074_v32 }
  0xe7   : > { %vm706_vm3 = vcmp.eq.s32.totalorder %v678_v57, %v1384_v46  ;;  %v566_v58 = vpop.permute.xlu0 %565 }
  0xe8   : > { %vm594_vm5 = vcmp.eq.s32.totalorder %v566_v58, %v1384_v46  ;;  %v1099_v0 = vsel %vm706_vm3, 1.0, %v1235_v49  ;;  %vm483_vm3 = vcmp.eq.s32.totalorder %v1473_v44, %v1384_v46  ;;  %v529_v44 = vadd.bf16 %v521_v28, %v1443_v22 }
  0xe9   : > { %v1083_v2 = vsel %vm594_vm5, 1.0, %v1235_v49  ;;  %v749_v60 = vpack.c.bf16 %v1099_v0, %v1098_v8  ;;  %vm697_vm5 = vcmp.eq.s32.totalorder %v1488_v41, %v1384_v46  ;;  %v1068_v53 = vsel %vm483_vm3, 1.0, %v1235_v49 }
  0xea   : > { %v637_v4 = vpack.c.bf16 %v1083_v2, %v1082_v63  ;;  %v1510_v5 = vpop.permute.xlu1 %659  ;;  %v1076_v41 = vsel %vm587_vm4, 1.0, %v1235_v49  ;;  %v1090_v54 = vsel %vm697_vm5, 1.0, %v1235_v49  ;;  %v641_v56 = vadd.bf16 %v633_v43, %v529_v44 }
  0xeb   : > { %v548_v9 = vpop.permute.xlu0 %547  ;;  %vm700_vm10 = vcmp.eq.s32.totalorder %v1510_v5, %v1384_v46  ;;  %v1069_v58 = vsel %vm484_vm6, 1.0, %v1235_v49  ;;  %v1084_v5 = vsel %vm595_vm9, 1.0, %v1235_v49  ;;  %v1049_v28 = vsel %vm368_vm0, 1.0, %v1235_v49 }
  0xec   : > { %v645_v11 = vadd.bf16 %v637_v4, %v533_v6  ;;  %vm588_vm1 = vcmp.eq.s32.totalorder %v548_v9, %v1384_v46  ;;  %v526_v2 = vpack.c.bf16 %v1069_v58, %v1068_v53  ;;  %v1093_v6 = vsel %vm700_vm10, 1.0, %v1235_v49 }
  0xed   : > { %v1077_v39 = vsel %vm588_vm1, 1.0, %v1235_v49  ;;  %vm477_vm3 = vcmp.eq.s32.totalorder %v1477_v31, %v1384_v46  ;;  %vm486_vm6 = vcmp.eq.s32.totalorder %v1481_v24, %v1384_v46  ;;  %vm480_vm9 = vcmp.eq.s32.totalorder %v1485_v48, %v1384_v46 }
  0xee   : > { %v1513_v61 = vpop.permute.xlu1 %683  ;;  %v757_v62 = vadd.bf16 %v749_v60, %v645_v11  ;;  %v634_v22 = vpack.c.bf16 %v1077_v39, %v1076_v41  ;;  %v534_v19 = vadd.bf16 %v526_v2, %v1455_v36  ;;  %v1065_v48 = vsel %vm480_vm9, 1.0, %v1235_v49 }
  0xef   : > { %v572_v12 = vpop.permute.xlu0 %571  ;;  %vm708_vm12 = vcmp.eq.s32.totalorder %v1513_v61, %v1384_v46 }
  0xf0   : > { %1157 = vmatprep.mubr.bf16.mxu1 %v757_v62  ;;  %v642_v9 = vadd.bf16 %v634_v22, %v530_v47 }
  0xf3   : > { %v210_v13 = vpop.permute.xlu1 %209  ;;  %v1517_v14 = vpop.permute.xlu0 %553 }
  0xf4   : > { %vm246_vm7 = vcmp.eq.s32.totalorder %v210_v13, %v1384_v46  ;;  %v1101_v13 = vsel %vm708_vm12, 1.0, %v1235_v49  ;;  %vm256_vm12 = vcmp.eq.s32.totalorder %v1428_v10, %v1384_v46  ;;  %vm590_vm0 = vcmp.eq.s32.totalorder %v1517_v14, %v1384_v46 }
  0xf5   : > { %v1031_v16 = vsel %vm246_vm7, 1.0, %v1235_v49  ;;  %vm596_vm7 = vcmp.eq.s32.totalorder %v572_v12, %v1384_v46 }
  0xf6   : > { %v291_v17 = vpack.c.bf16 %v1031_v16, %v1030_v15  ;;  %v1085_v59 = vsel %vm596_vm7, 1.0, %v1235_v49 }
  0xf7   : > { %v231_v18 = vpop.permute.xlu1 %230  ;;  %v1526_v20 = vpop.permute.xlu0 %556  ;;  %v638_v42 = vpack.c.bf16 %v1085_v59, %v1084_v5 }
  0xf8   : > { %vm253_vm11 = vcmp.eq.s32.totalorder %v231_v18, %v1384_v46 }
  0xf9   : > { %v1537_v3 = vsel %vm253_vm11, 1.0, %v1235_v49  ;;  %v646_v16 = vadd.bf16 %v638_v42, %v534_v19 }
  0xfa   : > { %v295_v23 = vpack.c.bf16 %v1532_v1, %v1537_v3 }
  0xfb   : > { %v1550_v27 = vpop.permute.xlu0 %580 }
  0xfc   : > { %v327_v33 = vpop.permute.xlu1 %326 }
  0xfd   : > { %vm365_vm2 = vcmp.eq.s32.totalorder %v327_v33, %v1384_v46 }
  0xfe   : > { %v1046_v26 = vsel %vm365_vm2, 1.0, %v1235_v49 }
  0xff   : > { %v411_v30 = vpack.c.bf16 %v1047_v34, %v1046_v26  ;;  %v1062_v26 = vsel %vm477_vm3, 1.0, %v1235_v49 }
 0x100   : > { %v654_v51 = vpop.permute.xlu0 %653  ;;  %v1569_v52 = vpop.permute.xlu1 %350 }
 0x101   : > { %v1574_v45 = vadd.bf16 %v411_v30, %v291_v17  ;;  %vm698_vm8 = vcmp.eq.s32.totalorder %v654_v51, %v1384_v46  ;;  %vm373_vm4 = vcmp.eq.s32.totalorder %v1569_v52, %v1384_v46  ;;  %v1071_v52 = vsel %vm486_vm6, 1.0, %v1235_v49 }
 0x102   : > { %v1091_v55 = vsel %vm698_vm8, 1.0, %v1235_v49  ;;  %v1054_v43 = vsel %vm373_vm4, 1.0, %v1235_v49  ;;  %vm599_vm4 = vcmp.eq.s32.totalorder %v1550_v27, %v1384_v46 }
 0x103   : > { %v745_v57 = vpack.c.bf16 %v1091_v55, %v1090_v54 }
 0x104   : > { %v657_v63 = vpop.permute.xlu0 %656  ;;  %v354_v0 = vpop.permute.xlu1 %353 }
 0x105   : > { %vm699_vm11 = vcmp.eq.s32.totalorder %v657_v63, %v1384_v46  ;;  %v753_v4 = vadd.bf16 %v745_v57, %v641_v56  ;;  %vm374_vm2 = vcmp.eq.s32.totalorder %v354_v0, %v1384_v46  ;;  %v1041_v56 = vsel %vm256_vm12, 1.0, %v1235_v49 }
 0x106   : > { %v1092_v8 = vsel %vm699_vm11, 1.0, %v1235_v49  ;;  %v1055_v7 = vsel %vm374_vm2, 1.0, %v1235_v49  ;;  %vm591_vm2 = vcmp.eq.s32.totalorder %v1526_v20, %v1384_v46 }
 0x107   : > { %v746_v11 = vpack.c.bf16 %v1093_v6, %v1092_v8  ;;  %1149 = vmatprep.mubr.bf16.mxu0 %v753_v4  ;;  %v415_v35 = vpack.c.bf16 %v1055_v7, %v1054_v43  ;;  %v1079_v4 = vsel %vm590_vm0, 1.0, %v1235_v49  ;;  %v1080_v14 = vsel %vm591_vm2, 1.0, %v1235_v49 }
 0x108   : > { %v681_v60 = vpop.permute.xlu0 %680 }
 0x109   : > { %vm707_vm13 = vcmp.eq.s32.totalorder %v681_v60, %v1384_v46  ;;  %v216_v62 = vpop.permute.xlu1 %215  ;;  %v754_v12 = vadd.bf16 %v746_v11, %v642_v9  ;;  %v423_v24 = vadd.bf16 %v415_v35, %v295_v23 }
 0x10a   : > { %v1100_v15 = vsel %vm707_vm13, 1.0, %v1235_v49  ;;  %vm248_vm14 = vcmp.eq.s32.totalorder %v216_v62, %v1384_v46 }
 0x10b   : > { %v750_v17 = vpack.c.bf16 %v1101_v13, %v1100_v15  ;;  %1150 = vmatmul.mubr.bf16.vlgmr.msra.gmra.mrb[0].mxu0 %v754_v12  ;;  %v1033_v36 = vsel %vm248_vm14, 1.0, %v1235_v49  ;;  %vm488_vm14 = vcmp.eq.s32.totalorder %v1490_v50, %v1384_v46 }
 0x10c   : > { %v292_v33 = vpack.c.bf16 %v1033_v36, %v1032_v25  ;;  %v1073_v59 = vsel %vm488_vm14, 1.0, %v1235_v49  ;;  %v663_v11 = vpop.permute.xlu0 %662 }
 0x10d   : > { %v237_v18 = vpop.permute.xlu1 %236  ;;  %v758_v21 = vadd.bf16 %v750_v17, %v646_v16  ;;  %v1088_v16 = vsel %vm599_vm4, 1.0, %v1235_v49 }
 0x10e   : > { %vm255_vm10 = vcmp.eq.s32.totalorder %v237_v18, %v1384_v46 }
 0x10f   : > { %1158 = vmatmul.mubr.bf16.vlgmr.msra.gmra.mrb[0].mxu1 %v758_v21  ;;  %v1040_v1 = vsel %vm255_vm10, 1.0, %v1235_v49 }
 0x110   : > { %v296_v57 = vpack.c.bf16 %v1041_v56, %v1040_v1  ;;  %v690_v13 = vpop.permute.xlu0 %689 }
 0x111   : > { %vm710_vm10 = vcmp.eq.s32.totalorder %v690_v13, %v1384_v46 }
 0x112   : > { %v333_v61 = vpop.permute.xlu1 %332 }
 0x113   : > { %vm367_vm1 = vcmp.eq.s32.totalorder %v333_v61, %v1384_v46 }
 0x114   : > { %v1048_v32 = vsel %vm367_vm1, 1.0, %v1235_v49  ;;  %v672_v25 = vpop.permute.xlu0 %671 }
 0x115   : > { %v412_v34 = vpack.c.bf16 %v1049_v28, %v1048_v32  ;;  %vm704_vm12 = vcmp.eq.s32.totalorder %v672_v25, %v1384_v46 }
 0x116   : > { %v357_v37 = vpop.permute.xlu1 %356  ;;  %v1097_v35 = vsel %vm704_vm12, 1.0, %v1235_v49 }
 0x117   : > { %v420_v40 = vadd.bf16 %v412_v34, %v292_v33  ;;  %vm375_vm11 = vcmp.eq.s32.totalorder %v357_v37, %v1384_v46 }
 0x118   : > { %v1056_v3 = vsel %vm375_vm11, 1.0, %v1235_v49 }
 0x11a   : > { %v360_v29 = vpop.permute.xlu1 %359 }
 0x11b   : > { %vm376_vm7 = vcmp.eq.s32.totalorder %v360_v29, %v1384_v46 }
 0x11f   : > { %v442_v38 = vpop.permute.xlu1 %441 }
 0x120   : > { %vm478_vm5 = vcmp.eq.s32.totalorder %v442_v38, %v1384_v46 }
 0x121   : > { %v1063_v30 = vsel %vm478_vm5, 1.0, %v1235_v49 }
 0x122   : > { %v523_v39 = vpack.c.bf16 %v1063_v30, %v1062_v26  ;;  %v696_v26 = vpop.permute.xlu0 %695 }
 0x123   : > { %v463_v31 = vpop.permute.xlu1 %462  ;;  %vm712_vm14 = vcmp.eq.s32.totalorder %v696_v26, %v1384_v46 }
 0x124   : > { %v531_v51 = vadd.bf16 %v523_v39, %v1574_v45  ;;  %vm485_vm8 = vcmp.eq.s32.totalorder %v463_v31, %v1384_v46  ;;  %v1057_v45 = vsel %vm376_vm7, 1.0, %v1235_v49  ;;  %vm701_vm7 = vcmp.eq.s32.totalorder %v663_v11, %v1384_v46 }
 0x125   : > { %v1070_v44 = vsel %vm485_vm8, 1.0, %v1235_v49  ;;  %v416_v55 = vpack.c.bf16 %v1057_v45, %v1056_v3  ;;  %v1094_v36 = vsel %vm701_vm7, 1.0, %v1235_v49 }
 0x126   : > { %v527_v53 = vpack.c.bf16 %v1071_v52, %v1070_v44  ;;  %v1105_v44 = vsel %vm712_vm14, 1.0, %v1235_v49 }
 0x127   : > { %v445_v41 = vpop.permute.xlu1 %444  ;;  %v424_v0 = vadd.bf16 %v416_v55, %v296_v57 }
 0x128   : > { %v1637_v54 = vadd.bf16 %v527_v53, %v423_v24  ;;  %vm479_vm13 = vcmp.eq.s32.totalorder %v445_v41, %v1384_v46  ;;  %v1106_v41 = vld [vmem:[%s1717_s2] ss:$0 sm:$0xff] }
 0x129   : > { %v1064_v23 = vsel %vm479_vm13, 1.0, %v1235_v49 }
 0x12a   : > { %v524_v22 = vpack.c.bf16 %v1065_v48, %v1064_v23 }
 0x12b   : > { %v469_v10 = vpop.permute.xlu1 %468 }
 0x12c   : > { %v532_v58 = vadd.bf16 %v524_v22, %v420_v40  ;;  %vm487_vm15 = vcmp.eq.s32.totalorder %v469_v10, %v1384_v46  ;;  %v1103_v40 = vsel %vm710_vm10, 1.0, %v1235_v49 }
 0x12d   : > { %v1072_v63 = vsel %vm487_vm15, 1.0, %v1235_v49 }
 0x12e   : > { %v528_v47 = vpack.c.bf16 %v1073_v59, %v1072_v63 }
 0x130   : > { %v536_v2 = vadd.bf16 %v528_v47, %v424_v0  ;;  %v551_v50 = vpop.permute.xlu1 %550 }
 0x131   : > { %vm589_vm1 = vcmp.eq.s32.totalorder %v551_v50, %v1384_v46 }
 0x132   : > { %v1078_v5 = vsel %vm589_vm1, 1.0, %v1235_v49 }
 0x133   : > { %v635_v6 = vpack.c.bf16 %v1079_v4, %v1078_v5 }
 0x134   : > { %v575_v8 = vpop.permute.xlu1 %574 }
 0x135   : > { %v643_v9 = vadd.bf16 %v635_v6, %v531_v51  ;;  %vm597_vm8 = vcmp.eq.s32.totalorder %v575_v8, %v1384_v46 }
 0x136   : > { %v1086_v61 = vsel %vm597_vm8, 1.0, %v1235_v49 }
 0x138   : > { %v578_v42 = vpop.permute.xlu1 %577 }
 0x139   : > { %vm598_vm6 = vcmp.eq.s32.totalorder %v578_v42, %v1384_v46 }
 0x13a   : > { %v1087_v18 = vsel %vm598_vm6, 1.0, %v1235_v49 }
 0x13b   : > { %v639_v32 = vpack.c.bf16 %v1087_v18, %v1086_v61 }
 0x13c   : > { %v560_v60 = vpop.permute.xlu1 %559 }
 0x13d   : > { %vm592_vm3 = vcmp.eq.s32.totalorder %v560_v60, %v1384_v46  ;;  %v647_v7 = vadd.bf16 %v639_v32, %v1637_v54 }
 0x13e   : > { %v1081_v19 = vsel %vm592_vm3, 1.0, %v1235_v49 }
 0x13f   : > { %v636_v62 = vpack.c.bf16 %v1081_v19, %v1080_v14 }
 0x140   : > { %v584_v12 = vpop.permute.xlu1 %583 }
 0x141   : > { %v644_v15 = vadd.bf16 %v636_v62, %v532_v58  ;;  %vm600_vm5 = vcmp.eq.s32.totalorder %v584_v12, %v1384_v46 }
 0x142   : > { %v1089_v20 = vsel %vm600_vm5, 1.0, %v1235_v49 }
 0x143   : > { %v640_v17 = vpack.c.bf16 %v1089_v20, %v1088_v16 }
 0x145   : > { %v648_v27 = vadd.bf16 %v640_v17, %v536_v2  ;;  %v666_v21 = vpop.permute.xlu1 %665 }
 0x146   : > { %vm702_vm9 = vcmp.eq.s32.totalorder %v666_v21, %v1384_v46 }
 0x147   : > { %v1095_v28 = vsel %vm702_vm9, 1.0, %v1235_v49 }
 0x148   : > { %v747_v33 = vpack.c.bf16 %v1095_v28, %v1094_v36 }
 0x149   : > { %v687_v34 = vpop.permute.xlu1 %686 }
 0x14a   : > { %vm709_vm11 = vcmp.eq.s32.totalorder %v687_v34, %v1384_v46  ;;  %v755_v37 = vadd.bf16 %v747_v33, %v643_v9 }
 0x14b   : > { %v1102_v29 = vsel %vm709_vm11, 1.0, %v1235_v49 }
 0x14c   : > { %v751_v38 = vpack.c.bf16 %v1103_v40, %v1102_v29  ;;  %1153 = vmatprep.mubr.bf16.mxu0 %v755_v37 }
 0x14d   : > { %v669_v43 = vpop.permute.xlu1 %668 }
 0x14e   : > { %vm703_vm13 = vcmp.eq.s32.totalorder %v669_v43, %v1384_v46  ;;  %v759_v30 = vadd.bf16 %v751_v38, %v647_v7 }
 0x14f   : > { %v1096_v39 = vsel %vm703_vm13, 1.0, %v1235_v49 }
 0x150   : > { %v748_v31 = vpack.c.bf16 %v1097_v35, %v1096_v39  ;;  %1161 = vmatprep.mubr.bf16.mxu1 %v759_v30 }
 0x151   : > { %v693_v51 = vpop.permute.xlu1 %692 }
 0x152   : > { %vm711_vm15 = vcmp.eq.s32.totalorder %v693_v51, %v1384_v46  ;;  %v756_v52 = vadd.bf16 %v748_v31, %v644_v15 }
 0x153   : > { %v1104_v24 = vsel %vm711_vm15, 1.0, %v1235_v49 }
 0x154   : > { %v752_v53 = vpack.c.bf16 %v1105_v44, %v1104_v24  ;;  %1154 = vmatmul.mubr.bf16.gmra.mrb[4].mxu0 %v756_v52 }
 0x156   : > { %v760_v45 = vadd.bf16 %v752_v53, %v648_v27 }
 0x158   : > { %1162 = vmatmul.mubr.bf16.gmra.mrb[4].mxu1 %v760_v45 }
 0x1de   : > { %v1151_v54 = vpop.f32.mrb[0].mxu0 }
 0x1df   : > { %v875_v48 = vadd.f32 %v1151_v54, %v1106_v41  ;;  %v866_v1 = vpop.f32.mrb[1].mxu0 }
 0x1e0   : > { %v867_v46 = vadd.f32 %v1106_v41, %v866_v1  ;;  %v1152_v49 = vpop.f32.mrb[2].mxu0 }
 0x1e1   : > { %v931_v3 = vmax.f32 %v875_v48, 0.0  ;;  %v878_v23 = vadd.f32 %v1152_v49, %v1106_v41  ;;  %v869_v55 = vpop.f32.mrb[3].mxu0 }
 0x1e2   : > { %v929_v22 = vmax.f32 %v867_v46, 0.0  ;;  %v870_v56 = vadd.f32 %v1106_v41, %v869_v55  ;;  %v1159_v10 = vpop.f32.mrb[0].mxu1 }
 0x1e3   : > { %947 = vst [vmem:[%s1694_s13 + $0x10] sm:$0xff] %v931_v3  ;;  %v932_v57 = vmax.f32 %v878_v23, 0.0  ;;  %v907_v58 = vadd.f32 %v1159_v10, %v1106_v41  ;;  %v898_v59 = vpop.f32.mrb[1].mxu1 }
 0x1e4   : > { %945 = vst [vmem:[%s1694_s13] sm:$0xff] %v929_v22  ;;  %v930_v63 = vmax.f32 %v870_v56, 0.0  ;;  %v899_v0 = vadd.f32 %v1106_v41, %v898_v59  ;;  %v1160_v47 = vpop.f32.mrb[2].mxu1 }
 0x1e5   : > { %948 = vst [vmem:[%s1694_s13 + $0x18] sm:$0xff] %v932_v57  ;;  %v939_v2 = vmax.f32 %v907_v58, 0.0  ;;  %v910_v50 = vadd.f32 %v1160_v47, %v1106_v41  ;;  %v901_v4 = vpop.f32.mrb[3].mxu1 }
 0x1e6   : > { %946 = vst [vmem:[%s1694_s13 + $0x8] sm:$0xff] %v930_v63  ;;  %v937_v5 = vmax.f32 %v899_v0, 0.0  ;;  %v902_v6 = vadd.f32 %v1106_v41, %v901_v4 }
 0x1e7   : > { %955 = vst [vmem:[%s1694_s13 + $0x50] sm:$0xff] %v939_v2  ;;  %v940_v8 = vmax.f32 %v910_v50, 0.0 }
 0x1e8   : > { %953 = vst [vmem:[%s1694_s13 + $0x40] sm:$0xff] %v937_v5  ;;  %v938_v9 = vmax.f32 %v902_v6, 0.0 }
 0x1e9   : > { %956 = vst [vmem:[%s1694_s13 + $0x58] sm:$0xff] %v940_v8 }
 0x1ea   : > { %954 = vst [vmem:[%s1694_s13 + $0x48] sm:$0xff] %v938_v9 }
 0x227   : > { %v1155_v42 = vpop.f32.mrb[4].mxu0 }
 0x228   : > { %v891_v11 = vadd.f32 %v1155_v42, %v1106_v41  ;;  %v882_v60 = vpop.f32.mrb[5].mxu0 }
 0x229   : > { %v883_v14 = vadd.f32 %v1106_v41, %v882_v60  ;;  %v1156_v19 = vpop.f32.mrb[6].mxu0 }
 0x22a   : > { %v935_v62 = vmax.f32 %v891_v11, 0.0  ;;  %v894_v12 = vadd.f32 %v1156_v19, %v1106_v41  ;;  %v885_v13 = vpop.f32.mrb[7].mxu0 }
 0x22b   : > { %v933_v15 = vmax.f32 %v883_v14, 0.0  ;;  %v886_v16 = vadd.f32 %v1106_v41, %v885_v13  ;;  %v1163_v20 = vpop.f32.mrb[4].mxu1 }
 0x22c   : > { %951 = vst [vmem:[%s1694_s13 + $0x30] sm:$0xff] %v935_v62  ;;  %v936_v17 = vmax.f32 %v894_v12, 0.0  ;;  %v923_v18 = vadd.f32 %v1163_v20, %v1106_v41  ;;  %v914_v27 = vpop.f32.mrb[5].mxu1 }
 0x22d   : > { %949 = vst [vmem:[%s1694_s13 + $0x20] sm:$0xff] %v933_v15  ;;  %v934_v21 = vmax.f32 %v886_v16, 0.0  ;;  %v915_v36 = vadd.f32 %v1106_v41, %v914_v27  ;;  %v1164_v61 = vpop.f32.mrb[6].mxu1 }
 0x22e   : > { %952 = vst [vmem:[%s1694_s13 + $0x38] sm:$0xff] %v936_v17  ;;  %v943_v25 = vmax.f32 %v923_v18, 0.0  ;;  %v926_v28 = vadd.f32 %v1164_v61, %v1106_v41  ;;  %v917_v32 = vpop.f32.mrb[7].mxu1 }
 0x22f   : > { %950 = vst [vmem:[%s1694_s13 + $0x28] sm:$0xff] %v934_v21  ;;  %v941_v33 = vmax.f32 %v915_v36, 0.0  ;;  %v918_v34 = vadd.f32 %v1106_v41, %v917_v32 }
 0x230   : > { %959 = vst [vmem:[%s1694_s13 + $0x70] sm:$0xff] %v943_v25  ;;  %v944_v37 = vmax.f32 %v926_v28, 0.0 }
 0x231   : > { %957 = vst [vmem:[%s1694_s13 + $0x60] sm:$0xff] %v941_v33  ;;  %v942_v40 = vmax.f32 %v918_v34, 0.0 }
 0x232   : > { %960 = vst [vmem:[%s1694_s13 + $0x78] sm:$0xff] %v944_v37 }
 0x233   : > { %958 = vst [vmem:[%s1694_s13 + $0x68] sm:$0xff] %v942_v40 }
 0x234 PF: > { %s13_s12 = sadd.s32 1, %s1228_s12  }
 0x235   : > { %p10_p4 = scmp.ge.s32.totalorder %s13_s12, 6  }
 0x237   :  { %12 = sbr.rel (!%p10_p4) target bundleno = 1 (0x1), region = 62 }

</bundles_post_ra>
